<compile_context>
chip_gen: v5e
topology: v5e:2x2
jax: 0.10.0
libtpu: 0.0.40
codegen_flags: <defaults>
</compile_context>

<pallas_src>
import jax
import jax.numpy as jnp
from jax.experimental import pallas as pl
from jax.experimental.pallas import tpu as pltpu


def _ast_encoder_kernel(idx_ref, tab_ref, out_ref):
    """idx_ref: (rows, 3*pack) int32 (already offset into the fused vocab),
    tab_ref: (V*pack, emb*pack) f32 block-diagonal table,
    out_ref: (rows, emb*pack) f32 lane-dense output."""
    rows = out_ref.shape[0]
    vtot = tab_ref.shape[0]

    idxs = idx_ref[...]                                        # (rows, 3*pack) int32
    iota = jax.lax.broadcasted_iota(jnp.int32, (rows, vtot), 1)

    # Multi-hot row: one 1 per (node, sub-table) pair; disjoint ranges so the
    # single matmul below sums the type + attribute + depth embeddings.
    hot = iota == idxs[:, 0:1]
    for c in range(1, idxs.shape[1]):
        hot = jnp.logical_or(hot, iota == idxs[:, c:c + 1])

    out_ref[...] = jnp.dot(hot.astype(jnp.float32), tab_ref[...],
                           preferred_element_type=jnp.float32
                           ).astype(out_ref.dtype)


def ast_feature_encoder(x, depth, type_tab, attr_tab, depth_tab, max_depth,
                        *, tile_rows=512):
    """x: (N, 2) int, depth: (N,) int -> (N, emb_dim) float32."""
    n = x.shape[0]
    emb = type_tab.shape[1]
    T, A, D = type_tab.shape[0], attr_tab.shape[0], depth_tab.shape[0]
    V = T + A + D

    # Lane packing: put `pack` consecutive nodes into one 128-lane output row.
    pack = 128 // emb if (emb < 128 and 128 % emb == 0) else 1
    lane_w = emb * pack
    vtot = V * pack

    # ---- index preprocessing (layout plumbing, cheap XLA elementwise) ----
    # PyTorch: depth[depth > max_depth] = max_depth  (clamp from above only).
    d = jnp.minimum(depth.astype(jnp.int32), jnp.int32(max_depth))
    idx = jnp.stack([x[:, 0].astype(jnp.int32),
                     x[:, 1].astype(jnp.int32) + T,
                     d + T + A], axis=1)                       # (n, 3)

    # Adaptive tile so tiny inputs don't pad to thousands of rows.
    rows_needed = -(-n // pack)
    tile_r = max(8, min(tile_rows, -(-rows_needed // 8) * 8))
    nodes_per_tile = tile_r * pack
    n_pad = -(-n // nodes_per_tile) * nodes_per_tile
    if n_pad != n:
        # Out-of-range pad index -> all-zero one-hot row -> zero output row.
        idx = jnp.pad(idx, ((0, n_pad - n), (0, 0)), constant_values=vtot)

    # Per-node sub-block offset inside the 128-lane row, then interleave.
    idx = idx + (jnp.arange(n_pad, dtype=jnp.int32) % pack)[:, None] * V
    idx = idx.reshape(n_pad // pack, 3 * pack)

    # ---- fused (block-diagonal) embedding table ----
    cat = jnp.concatenate([type_tab, attr_tab, depth_tab],
                          axis=0).astype(jnp.float32)          # (V, emb)
    if pack == 1:
        big_tab = cat
    else:
        big_tab = jax.scipy.linalg.block_diag(*([cat] * pack))  # (V*pack, emb*pack)

    num_rows = n_pad // pack
    grid = (num_rows // tile_r,)

    # TODO(synk): like the previous version, out-of-vocab ids yield a zero row
    # instead of torch.nn.Embedding's index error; inputs are assumed valid.
    out = pl.pallas_call(
        _ast_encoder_kernel,
        out_shape=jax.ShapeDtypeStruct((num_rows, lane_w), jnp.float32),
        grid_spec=pltpu.PrefetchScalarGridSpec(
            num_scalar_prefetch=0,
            grid=grid,
            in_specs=[
                pl.BlockSpec((tile_r, 3 * pack), lambda i: (i, 0)),
                # Constant index map -> table DMA'd once, not per step.
                pl.BlockSpec((vtot, lane_w), lambda i: (0, 0)),
            ],
            out_specs=pl.BlockSpec((tile_r, lane_w), lambda i: (i, 0)),
        ),
        compiler_params=pltpu.CompilerParams(
            dimension_semantics=("parallel",)),
    )(idx, big_tab)

    # (num_rows, emb*pack) row-major is bit-identical to (n_pad, emb).
    return out.reshape(n_pad, emb)[:n]


def _reference(x, depth, type_tab, attr_tab, depth_tab, max_depth):
    d = jnp.where(depth > max_depth, max_depth, depth)
    return type_tab[x[:, 0]] + attr_tab[x[:, 1]] + depth_tab[d]


if __name__ == "__main__":
    emb_dim = 32
    num_nodetypes = 16
    num_nodeattributes = 16
    max_depth = 7
    n = 50   # not a multiple of pack/tile -> exercises padding + slicing

    key = jax.random.PRNGKey(0)
    k1, k2, k3, k4, k5, k6 = jax.random.split(key, 6)

    # Deterministic "weights" (nn.Embedding tables).
    type_tab = jax.random.normal(k1, (num_nodetypes, emb_dim), jnp.float32)
    attr_tab = jax.random.normal(k2, (num_nodeattributes, emb_dim), jnp.float32)
    depth_tab = jax.random.normal(k3, (max_depth + 1, emb_dim), jnp.float32)

    # x[:,0] = type ids, x[:,1] = attribute ids; depth may exceed max_depth
    # to exercise the clamp.
    x = jnp.stack(
        [jax.random.randint(k4, (n,), 0, num_nodetypes),
         jax.random.randint(k5, (n,), 0, num_nodeattributes)], axis=1
    ).astype(jnp.int32)
    depth = jax.random.randint(k6, (n,), 0, max_depth + 4).astype(jnp.int32)

    out = ast_feature_encoder(x, depth, type_tab, attr_tab, depth_tab,
                              max_depth)
    out = jax.block_until_ready(out)

    ref = _reference(x, depth, type_tab, attr_tab, depth_tab, max_depth)
    assert out.shape == (n, emb_dim)
    assert jnp.allclose(out, ref, atol=1e-5, rtol=1e-5)

    # Small multi-tile check (grid > 1) with a tiny tile size.
    n2 = 300
    x2 = jnp.stack(
        [jax.random.randint(jax.random.PRNGKey(7), (n2,), 0, num_nodetypes),
         jax.random.randint(jax.random.PRNGKey(8), (n2,), 0,
                            num_nodeattributes)], axis=1).astype(jnp.int32)
    depth2 = jax.random.randint(jax.random.PRNGKey(9), (n2,), 0,
                                max_depth + 4).astype(jnp.int32)
    out2 = jax.block_until_ready(
        ast_feature_encoder(x2, depth2, type_tab, attr_tab, depth_tab,
                            max_depth, tile_rows=32))
    ref2 = _reference(x2, depth2, type_tab, attr_tab, depth_tab, max_depth)
    assert jnp.allclose(out2, ref2, atol=1e-5, rtol=1e-5)

    print("KERNEL_OK")
</pallas_src>

<mosaic_0001>
module attributes {stable_mosaic.version = 11 : i64} {
  func.func @_ast_encoder_kernel(%arg0: i32, %arg1: memref<16x12xi32, #tpu.memory_space<vmem>>, %arg2: memref<160x128xf32, #tpu.memory_space<vmem>>, %arg3: memref<16x128xf32, #tpu.memory_space<vmem>>) attributes {dimension_semantics = [#tpu.dimension_semantics<parallel>], iteration_bounds = array<i64: 1>, scalar_prefetch = 0 : i64, scratch_operands = 0 : i64, tpu.core_type = #tpu.core_type<tc>, window_params = [{transform_indices = @transform_0, window_bounds = array<i64: 16, 12>}, {pipeline_mode = #tpu.pipeline_mode<synchronous>, transform_indices = @transform_1, window_bounds = array<i64: 160, 128>}, {transform_indices = @transform_2, window_bounds = array<i64: 16, 128>}]} {
    %c0 = arith.constant 0 : index
    %c0_0 = arith.constant 0 : index
    %0 = vector.load %arg1[%c0, %c0_0] : memref<16x12xi32, #tpu.memory_space<vmem>>, vector<16x12xi32>
    %1 = tpu.iota {dimensions = array<i32: 1>} : vector<16x160xi32>
    %2 = vector.extract_strided_slice %0 {offsets = [0, 0], sizes = [16, 1], strides = [1, 1]} : vector<16x12xi32> to vector<16x1xi32>
    %3 = vector.broadcast %2 : vector<16x1xi32> to vector<16x160xi32>
    %4 = arith.cmpi eq, %1, %3 : vector<16x160xi32>
    %5 = vector.extract_strided_slice %0 {offsets = [0, 1], sizes = [16, 1], strides = [1, 1]} : vector<16x12xi32> to vector<16x1xi32>
    %6 = vector.broadcast %5 : vector<16x1xi32> to vector<16x160xi32>
    %7 = arith.cmpi eq, %1, %6 : vector<16x160xi32>
    %8 = arith.ori %4, %7 : vector<16x160xi1>
    %9 = vector.extract_strided_slice %0 {offsets = [0, 2], sizes = [16, 1], strides = [1, 1]} : vector<16x12xi32> to vector<16x1xi32>
    %10 = vector.broadcast %9 : vector<16x1xi32> to vector<16x160xi32>
    %11 = arith.cmpi eq, %1, %10 : vector<16x160xi32>
    %12 = arith.ori %8, %11 : vector<16x160xi1>
    %13 = vector.extract_strided_slice %0 {offsets = [0, 3], sizes = [16, 1], strides = [1, 1]} : vector<16x12xi32> to vector<16x1xi32>
    %14 = vector.broadcast %13 : vector<16x1xi32> to vector<16x160xi32>
    %15 = arith.cmpi eq, %1, %14 : vector<16x160xi32>
    %16 = arith.ori %12, %15 : vector<16x160xi1>
    %17 = vector.extract_strided_slice %0 {offsets = [0, 4], sizes = [16, 1], strides = [1, 1]} : vector<16x12xi32> to vector<16x1xi32>
    %18 = vector.broadcast %17 : vector<16x1xi32> to vector<16x160xi32>
    %19 = arith.cmpi eq, %1, %18 : vector<16x160xi32>
    %20 = arith.ori %16, %19 : vector<16x160xi1>
    %21 = vector.extract_strided_slice %0 {offsets = [0, 5], sizes = [16, 1], strides = [1, 1]} : vector<16x12xi32> to vector<16x1xi32>
    %22 = vector.broadcast %21 : vector<16x1xi32> to vector<16x160xi32>
    %23 = arith.cmpi eq, %1, %22 : vector<16x160xi32>
    %24 = arith.ori %20, %23 : vector<16x160xi1>
    %25 = vector.extract_strided_slice %0 {offsets = [0, 6], sizes = [16, 1], strides = [1, 1]} : vector<16x12xi32> to vector<16x1xi32>
    %26 = vector.broadcast %25 : vector<16x1xi32> to vector<16x160xi32>
    %27 = arith.cmpi eq, %1, %26 : vector<16x160xi32>
    %28 = arith.ori %24, %27 : vector<16x160xi1>
    %29 = vector.extract_strided_slice %0 {offsets = [0, 7], sizes = [16, 1], strides = [1, 1]} : vector<16x12xi32> to vector<16x1xi32>
    %30 = vector.broadcast %29 : vector<16x1xi32> to vector<16x160xi32>
    %31 = arith.cmpi eq, %1, %30 : vector<16x160xi32>
    %32 = arith.ori %28, %31 : vector<16x160xi1>
    %33 = vector.extract_strided_slice %0 {offsets = [0, 8], sizes = [16, 1], strides = [1, 1]} : vector<16x12xi32> to vector<16x1xi32>
    %34 = vector.broadcast %33 : vector<16x1xi32> to vector<16x160xi32>
    %35 = arith.cmpi eq, %1, %34 : vector<16x160xi32>
    %36 = arith.ori %32, %35 : vector<16x160xi1>
    %37 = vector.extract_strided_slice %0 {offsets = [0, 9], sizes = [16, 1], strides = [1, 1]} : vector<16x12xi32> to vector<16x1xi32>
    %38 = vector.broadcast %37 : vector<16x1xi32> to vector<16x160xi32>
    %39 = arith.cmpi eq, %1, %38 : vector<16x160xi32>
    %40 = arith.ori %36, %39 : vector<16x160xi1>
    %41 = vector.extract_strided_slice %0 {offsets = [0, 10], sizes = [16, 1], strides = [1, 1]} : vector<16x12xi32> to vector<16x1xi32>
    %42 = vector.broadcast %41 : vector<16x1xi32> to vector<16x160xi32>
    %43 = arith.cmpi eq, %1, %42 : vector<16x160xi32>
    %44 = arith.ori %40, %43 : vector<16x160xi1>
    %45 = vector.extract_strided_slice %0 {offsets = [0, 11], sizes = [16, 1], strides = [1, 1]} : vector<16x12xi32> to vector<16x1xi32>
    %46 = vector.broadcast %45 : vector<16x1xi32> to vector<16x160xi32>
    %47 = arith.cmpi eq, %1, %46 : vector<16x160xi32>
    %48 = arith.ori %44, %47 : vector<16x160xi1>
    %49 = arith.extui %48 : vector<16x160xi1> to vector<16x160xi32>
    %50 = arith.sitofp %49 : vector<16x160xi32> to vector<16x160xf32>
    %c0_1 = arith.constant 0 : index
    %c0_2 = arith.constant 0 : index
    %51 = vector.load %arg2[%c0_1, %c0_2] : memref<160x128xf32, #tpu.memory_space<vmem>>, vector<160x128xf32>
    %cst = arith.constant dense<0.000000e+00> : vector<16x128xf32>
    %52 = tpu.matmul %50, %51, %cst {dimension_numbers = #tpu.dot_dimension_numbers<[1], [0], [0], [1], [0, 0, 1, 1], [], []>} : vector<16x160xf32>, vector<160x128xf32>, vector<16x128xf32> -> vector<16x128xf32>
    %c0_3 = arith.constant 0 : index
    %c0_4 = arith.constant 0 : index
    %53 = vector.load %arg3[%c0_3, %c0_4] : memref<16x128xf32, #tpu.memory_space<vmem>>, vector<16x128xf32>
    tpu.vector_store %arg3[%c0_3, %c0_4], %52 {strides = array<i32>} : memref<16x128xf32, #tpu.memory_space<vmem>>, vector<16x128xf32>,
    return
  }
  func.func @transform_0(%arg0: i32) -> (i32, i32) {
    %c0_i32 = arith.constant 0 : i32
    %c0_i32_0 = arith.constant 0 : i32
    return %arg0, %c0_i32 : i32, i32
  }
  func.func @transform_1(%arg0: i32) -> (i32, i32) {
    %c0_i32 = arith.constant 0 : i32
    %c0_i32_0 = arith.constant 0 : i32
    %c0_i32_1 = arith.constant 0 : i32
    return %c0_i32, %c0_i32_0 : i32, i32
  }
  func.func @transform_2(%arg0: i32) -> (i32, i32) {
    %c0_i32 = arith.constant 0 : i32
    %c0_i32_0 = arith.constant 0 : i32
    return %arg0, %c0_i32 : i32, i32
  }
}

</mosaic_0001>

<bundles_post_ra>
// kernel: tpu_custom_call.1
= control target key start
LH: loop header
LB: loop body
LE: loop exit
PB: predicated region body
PF: predicated region fallthrough
CT: control target
= control target key end

     0   :  { %7 = vsyncpa [#allocation3], 0  ;;  %s651_s0 = inlined_call_operand.hbm [shape: s32[16,12], index: 0, kind: input, shape index: {}]   ;;  %s652_s1 = inlined_call_operand.hbm [shape: f32[160,128], index: 1, kind: input, shape index: {}]   ;;  %s653_s2 = inlined_call_operand.hbm [shape: f32[16,128], index: 2, kind: output, shape index: {}]  }
   0x1   :  { %8 = vsyncpa [#allocation6], 0 }
   0x2   :  { %9 = vsyncpa [#allocation4], 0  ;;  %s14_s11 = sshll.u32 %s651_s0, 4  ;;  %s455_s12 = smov [#allocation2]   ;;  %s15_s11 = int_to_ptr.hbm [resolvable:$true] %s14_s11 }
   0x3   :  { %s16_s13 = sshll.u32 %s455_s12, 4  ;;  %s27_s16 = sshll.u32 %s652_s1, 4  ;;  %s17_s13 = int_to_ptr.vmem [resolvable:$true] %s16_s13  ;;  %s28_s16 = int_to_ptr.hbm [resolvable:$true] %s27_s16 }
   0x4   :  { %s456_s17 = smov 128   ;;  %s457_s18 = smov 8  }
   0x5   :  { %22 = dma.hbm_to_vmem [thread:$0]  %s15_s11, 256, %s17_s13, [#allocation3], %s456_s17, %s456_s17, %s457_s18  }
   0x6   :  { %s458_s19 = smov [#allocation5]  }
   0x7   :  { %s29_s20 = sshll.u32 %s458_s19, 4  ;;  %s30_s20 = int_to_ptr.vmem [resolvable:$true] %s29_s20 }
   0x8   :  { %35 = dma.hbm_to_vmem [thread:$0]  %s28_s16, 2560, %s30_s20, [#allocation6], %s456_s17, %s456_s17, %s457_s18  }
   0x9   :  { %449 = dma.done.wait [#allocation3], 256  }
   0xa   :  { %450 = vsyncadd [#allocation3], 4294967040 }
   0xb   :  { %451 = dma.done.wait [#allocation6], 2560  }
   0xc   :  { %452 = vsyncadd [#allocation6], 4294964736  ;;  %v459_v0 = vmov 2   ;;  %v460_v1 = vmov 0   ;;  %v461_v2 = vmov 1   ;;  %v44_v3 = vld [vmem:[#allocation2] sm:$0xff]  ;;  %v46_v34 = vlaneseq }
   0xd   :  { %358 = vset.pattern.permute.xlu1 %v459_v0  ;;  %356 = vset.pattern.permute.xlu0 %v460_v1  ;;  %v45_v4 = vld [vmem:[#allocation2 + $0x8] sm:$0xff]  ;;  %v462_v5 = vmov 3   ;;  %v463_v6 = vmov 4   ;;  %v464_v7 = vmov 5   ;;  %v465_v8 = vmov 7   ;;  %v235_v18 = vld [vmem:[#allocation5 + $0x70] sm:$0xff] }
   0xe   :  { %360 = vset.pattern.permute.xlu2 %v461_v2  ;;  %74 = vperm.xlu1 %358, %v44_v3   ;;  %v466_v9 = vmov 6   ;;  %v467_v10 = vmov 8   ;;  %v468_v11 = vmov 11   ;;  %v469_v12 = vmov 9   ;;  %v236_v17 = vld [vmem:[#allocation5 + $0x78] sm:$0xff]  ;;  %v234_v20 = vld [vmem:[#allocation5 + $0x68] sm:$0xff] }
   0xf   :  { %50 = vperm.xlu0 %356, %v44_v3   ;;  %63 = vperm.xlu2 %360, %v45_v4   ;;  %v470_v13 = vmov 10   ;;  %v233_v21 = vld [vmem:[#allocation5 + $0x60] sm:$0xff]  ;;  %v232_v24 = vld [vmem:[#allocation5 + $0x58] sm:$0xff]  ;;  %v231_v25 = vld [vmem:[#allocation5 + $0x50] sm:$0xff]  ;;  %v518_v39 = vand.u32 127, %v46_v34  ;;  %v664_v61 = vmov 0 }
  0x10   :  { %322 = vmatpush.msra.mxu2 %v236_v17  ;;  %248 = vmatpush.msra.mxu0 %v236_v17  ;;  %v230_v26 = vld [vmem:[#allocation5 + $0x48] sm:$0xff]  ;;  %v229_v28 = vld [vmem:[#allocation5 + $0x40] sm:$0xff]  ;;  %v228_v30 = vld [vmem:[#allocation5 + $0x38] sm:$0xff]  ;;  %s472_s0 = smov [#allocation7]   ;;  %s302_s23 = sshll.u32 %s653_s2, 4  ;;  %s303_s23 = int_to_ptr.hbm [resolvable:$true] %s302_s23 }
  0x11   :  { %v227_v32 = vld [vmem:[#allocation5 + $0x30] sm:$0xff]  ;;  %v226_v33 = vld [vmem:[#allocation5 + $0x28] sm:$0xff]  ;;  %v225_v35 = vld [vmem:[#allocation5 + $0x20] sm:$0xff]  ;;  %v523_v42 = vadd.s32 128, %v518_v39  ;;  %s300_s1 = sshll.u32 %s472_s0, 4  ;;  %s301_s1 = int_to_ptr.vmem [resolvable:$true] %s300_s1 }
  0x12   :  { %323 = vmatpush.msra.mxu2 %v235_v18  ;;  %249 = vmatpush.msra.mxu0 %v235_v18  ;;  %v224_v38 = vld [vmem:[#allocation5 + $0x18] sm:$0xff]  ;;  %v223_v41 = vld [vmem:[#allocation5 + $0x10] sm:$0xff]  ;;  %v222_v43 = vld [vmem:[#allocation5 + $0x8] sm:$0xff] }
  0x13   :  { %v221_v44 = vld [vmem:[#allocation5] sm:$0xff]  ;;  %v240_v47 = vld [vmem:[#allocation5 + $0x98] sm:$0xff]  ;;  %v239_v48 = vld [vmem:[#allocation5 + $0x90] sm:$0xff] }
  0x14   :  { %324 = vmatpush.msra.mxu2 %v234_v20  ;;  %250 = vmatpush.msra.mxu0 %v234_v20  ;;  %v238_v55 = vld [vmem:[#allocation5 + $0x88] sm:$0xff]  ;;  %v237_v56 = vld [vmem:[#allocation5 + $0x80] sm:$0xff] }
  0x15   :  { %283 = vmatpush.msra.mxu1 %v240_v47 }
  0x16   :  { %359 = vset.pattern.permute.xlu1 %v460_v1  ;;  %325 = vmatpush.msra.mxu2 %v233_v21 }
  0x17   :  { %357 = vset.pattern.permute.xlu0 %v461_v2  ;;  %53 = vperm.xlu1 %359, %v45_v4  }
  0x18   :  { %60 = vperm.xlu0 %357, %v44_v3   ;;  %361 = vset.pattern.permute.xlu2 %v462_v5 }
  0x19   :  { %88 = vperm.xlu2 %361, %v44_v3   ;;  %251 = vmatpush.msra.mxu0 %v233_v21 }
  0x1a   :  { %326 = vmatpush.msra.mxu2 %v232_v24  ;;  %284 = vmatpush.msra.mxu1 %v239_v48 }
  0x1b   :  { %252 = vmatpush.msra.mxu0 %v232_v24 }
  0x1c   :  { %327 = vmatpush.msra.mxu2 %v231_v25  ;;  %285 = vmatpush.msra.mxu1 %v238_v55 }
  0x1d   :  { %253 = vmatpush.msra.mxu0 %v231_v25 }
  0x1e   :  { %328 = vmatpush.msra.mxu2 %v230_v26  ;;  %286 = vmatpush.msra.mxu1 %v237_v56 }
  0x1f   :  { %362 = vset.pattern.permute.xlu1 %v459_v0  ;;  %254 = vmatpush.msra.mxu0 %v230_v26 }
  0x20   :  { %364 = vset.pattern.permute.xlu0 %v462_v5  ;;  %77 = vperm.xlu1 %362, %v45_v4  }
  0x21   :  { %91 = vperm.xlu0 %364, %v45_v4   ;;  %363 = vset.pattern.permute.xlu2 %v463_v6 }
  0x22   :  { %102 = vperm.xlu2 %363, %v44_v3   ;;  %329 = vmatpush.msra.mxu2 %v229_v28 }
  0x23   :  { %255 = vmatpush.msra.mxu0 %v229_v28 }
  0x24   :  { %330 = vmatpush.msra.mxu2 %v228_v30 }
  0x25   :  { %256 = vmatpush.msra.mxu0 %v228_v30 }
  0x26   :  { %331 = vmatpush.msra.mxu2 %v227_v32 }
  0x27   :  { %257 = vmatpush.msra.mxu0 %v227_v32 }
  0x28   :  { %365 = vset.pattern.permute.xlu1 %v464_v7  ;;  %332 = vmatpush.msra.mxu2 %v226_v33 }
  0x29   :  { %368 = vset.pattern.permute.xlu0 %v465_v8  ;;  %116 = vperm.xlu1 %365, %v44_v3  }
  0x2a   :  { %144 = vperm.xlu0 %368, %v44_v3   ;;  %105 = vperm.xlu2 %363, %v45_v4  }
  0x2b   :  { %258 = vmatpush.msra.mxu0 %v226_v33  ;;  %333 = vmatpush.msra.mxu2 %v225_v35 }
  0x2d   :  { %259 = vmatpush.msra.mxu0 %v225_v35  ;;  %334 = vmatpush.msra.mxu2 %v224_v38 }
  0x2f   :  { %260 = vmatpush.msra.mxu0 %v224_v38  ;;  %335 = vmatpush.msra.mxu2 %v223_v41 }
  0x31   :  { %366 = vset.pattern.permute.xlu1 %v466_v9  ;;  %261 = vmatpush.msra.mxu0 %v223_v41 }
  0x32   :  { %372 = vset.pattern.permute.xlu0 %v467_v10  ;;  %130 = vperm.xlu1 %366, %v44_v3  }
  0x33   :  { %367 = vset.pattern.permute.xlu2 %v464_v7  ;;  %161 = vperm.xlu0 %372, %v45_v4  }
  0x34   :  { %119 = vperm.xlu2 %367, %v45_v4   ;;  %336 = vmatpush.msra.mxu2 %v222_v43 }
  0x35   :  { %262 = vmatpush.msra.mxu0 %v222_v43 }
  0x36   :  { %337 = vmatpush.msra.mxu2 %v221_v44 }
  0x37   :  { %263 = vmatpush.msra.mxu0 %v221_v44 }
  0x3a   :  { %133 = vperm.xlu1 %366, %v45_v4  }
  0x3b   :  { %376 = vset.pattern.permute.xlu0 %v468_v11 }
  0x3c   :  { %369 = vset.pattern.permute.xlu2 %v467_v10  ;;  %203 = vperm.xlu0 %376, %v45_v4  }
  0x3d   :  { %158 = vperm.xlu2 %369, %v44_v3  }
  0x42   :  { %370 = vset.pattern.permute.xlu1 %v465_v8 }
  0x43   :  { %147 = vperm.xlu1 %370, %v45_v4  }
  0x45   :  { %371 = vset.pattern.permute.xlu2 %v469_v12 }
  0x46   :  { %172 = vperm.xlu2 %371, %v44_v3  }
  0x4b   :  { %373 = vset.pattern.permute.xlu1 %v470_v13 }
  0x4c   :  { %186 = vperm.xlu1 %373, %v44_v3  }
  0x4e   :  { %175 = vperm.xlu2 %371, %v45_v4  }
  0x54   :  { %374 = vset.pattern.permute.xlu1 %v468_v11 }
  0x55   :  { %200 = vperm.xlu1 %374, %v44_v3  }
  0x56   :  { %375 = vset.pattern.permute.xlu2 %v470_v13 }
  0x57   :  { %189 = vperm.xlu2 %375, %v45_v4   ;;  %v471_v4 = vmov 0.0  }
  0x69   :  { %v500_v14 = vpop.permute.xlu2 %63 }
  0x6a   :  { %vm67_vm3 = vcmp.eq.s32.totalorder %v518_v39, %v500_v14  ;;  %vm68_vm9 = vcmp.eq.s32.totalorder %v523_v42, %v500_v14 }
  0x73   :  { %v502_v15 = vpop.permute.xlu2 %88 }
  0x74   :  { %vm93_vm14 = vcmp.eq.s32.totalorder %v518_v39, %v502_v15 }
  0x7c   :  { %v504_v16 = vpop.permute.xlu2 %102 }
  0x80   :  { %v506_v19 = vpop.permute.xlu1 %74 }
  0x81   :  { %v51_v27 = vpop.permute.xlu0 %50  ;;  %vm79_vm11 = vcmp.eq.s32.totalorder %v518_v39, %v506_v19  ;;  %vm80_vm15 = vcmp.eq.s32.totalorder %v523_v42, %v506_v19 }
  0x82   :  { %vm55_vm1 = vcmp.eq.s32.totalorder %v518_v39, %v51_v27  ;;  %vm56_vm4 = vcmp.eq.s32.totalorder %v523_v42, %v51_v27 }
  0x84   :  { %v508_v22 = vpop.permute.xlu2 %105 }
  0x89   :  { %v510_v23 = vpop.permute.xlu1 %53 }
  0x8a   :  { %v61_v36 = vpop.permute.xlu0 %60  ;;  %vm57_vm0 = vcmp.eq.s32.totalorder %v518_v39, %v510_v23  ;;  %vm58_vm6 = vcmp.eq.s32.totalorder %v523_v42, %v510_v23 }
  0x8b   :  { %vm65_vm2 = vcmp.eq.s32.totalorder %v518_v39, %v61_v36  ;;  %vm66_vm5 = vcmp.eq.s32.totalorder %v523_v42, %v61_v36  ;;  %vm535_vm7 = vmor %vm57_vm0, %vm67_vm3 }
  0x8c   :  { %vm69_vm8 = vmor %vm55_vm1, %vm65_vm2 }
  0x8d   :  { %vm70_vm10 = vmor %vm56_vm4, %vm66_vm5  ;;  %vm94_vm5 = vcmp.eq.s32.totalorder %v523_v42, %v502_v15 }
  0x8e   :  { %v512_v29 = vpop.permute.xlu2 %119  ;;  %vm545_vm12 = vmor %vm58_vm6, %vm68_vm9 }
  0x8f   :  { %vm83_vm0 = vmor %vm69_vm8, %vm79_vm11  ;;  %vm107_vm11 = vcmp.eq.s32.totalorder %v518_v39, %v504_v16 }
  0x90   :  { %vm555_vm1 = vmor %vm70_vm10, %vm80_vm15 }
  0x91   :  { %vm566_vm6 = vmor %vm83_vm0, %vm93_vm14  ;;  %vm123_vm0 = vcmp.eq.s32.totalorder %v518_v39, %v512_v29 }
  0x92   :  { %v514_v31 = vpop.permute.xlu1 %77 }
  0x93   :  { %v92_v45 = vpop.permute.xlu0 %91  ;;  %vm81_vm13 = vcmp.eq.s32.totalorder %v518_v39, %v514_v31  ;;  %vm82_vm2 = vcmp.eq.s32.totalorder %v523_v42, %v514_v31 }
  0x94   :  { %vm85_vm3 = vmor %vm535_vm7, %vm81_vm13  ;;  %vm95_vm4 = vcmp.eq.s32.totalorder %v518_v39, %v92_v45  ;;  %vm96_vm9 = vcmp.eq.s32.totalorder %v523_v42, %v92_v45  ;;  %vm109_vm7 = vcmp.eq.s32.totalorder %v518_v39, %v508_v22 }
  0x95   :  { %vm86_vm8 = vmor %vm545_vm12, %vm82_vm2  ;;  %vm110_vm12 = vcmp.eq.s32.totalorder %v523_v42, %v508_v22  ;;  %vm108_vm2 = vcmp.eq.s32.totalorder %v523_v42, %v504_v16 }
  0x96   :  { %vm99_vm10 = vmor %vm85_vm3, %vm95_vm4 }
  0x97   :  { %v516_v37 = vpop.permute.xlu2 %158  ;;  %vm579_vm13 = vmor %vm555_vm1, %vm94_vm5 }
  0x98   :  { %vm100_vm14 = vmor %vm86_vm8, %vm96_vm9  ;;  %vm124_vm9 = vcmp.eq.s32.totalorder %v523_v42, %v512_v29 }
  0x99   :  { %vm113_vm15 = vmor %vm99_vm10, %vm109_vm7 }
  0x9a   :  { %vm111_vm1 = vmor %vm566_vm6, %vm107_vm11 }
  0x9b   :  { %v520_v40 = vpop.permute.xlu1 %116  ;;  %vm114_vm3 = vmor %vm100_vm14, %vm110_vm12 }
  0x9c   :  { %v145_v53 = vpop.permute.xlu0 %144  ;;  %vm121_vm4 = vcmp.eq.s32.totalorder %v518_v39, %v520_v40  ;;  %vm127_vm5 = vmor %vm113_vm15, %vm123_vm0  ;;  %vm122_vm8 = vcmp.eq.s32.totalorder %v523_v42, %v520_v40 }
  0x9d   :  { %vm112_vm7 = vmor %vm579_vm13, %vm108_vm2 }
  0x9e   :  { %vm125_vm6 = vmor %vm111_vm1, %vm121_vm4  ;;  %vm149_vm4 = vcmp.eq.s32.totalorder %v518_v39, %v145_v53 }
  0x9f   :  { %vm126_vm12 = vmor %vm112_vm7, %vm122_vm8 }
  0xa0   :  { %v539_v49 = vpop.permute.xlu2 %172  ;;  %vm601_vm14 = vmor %vm114_vm3, %vm124_vm9  ;;  %vm150_vm9 = vcmp.eq.s32.totalorder %v523_v42, %v145_v53 }
  0xa1   :  { %v665_v61 = vsel %vm601_vm14, 4294967295, %v664_v61 }
  0xa4   :  { %v131_v50 = vpop.permute.xlu1 %130 }
  0xa5   :  { %v162_v60 = vpop.permute.xlu0 %161  ;;  %vm135_vm10 = vcmp.eq.s32.totalorder %v518_v39, %v131_v50  ;;  %vm136_vm15 = vcmp.eq.s32.totalorder %v523_v42, %v131_v50 }
  0xa6   :  { %vm139_vm0 = vmor %vm125_vm6, %vm135_vm10  ;;  %vm165_vm13 = vcmp.eq.s32.totalorder %v518_v39, %v162_v60 }
  0xa7   :  { %vm140_vm8 = vmor %vm126_vm12, %vm136_vm15 }
  0xa8   :  { %v176_v59 = vpop.permute.xlu2 %175  ;;  %vm611_vm6 = vmor %vm139_vm0, %vm149_vm4  ;;  %vm163_vm0 = vcmp.eq.s32.totalorder %v518_v39, %v516_v37 }
  0xa9   :  { %vm179_vm3 = vcmp.eq.s32.totalorder %v518_v39, %v176_v59 }
  0xac   :  { %v134_v58 = vpop.permute.xlu1 %133 }
  0xad   :  { %vm137_vm11 = vcmp.eq.s32.totalorder %v518_v39, %v134_v58  ;;  %vm138_vm10 = vcmp.eq.s32.totalorder %v523_v42, %v134_v58 }
  0xae   :  { %vm141_vm2 = vmor %vm127_vm5, %vm137_vm11  ;;  %v204_v1 = vpop.permute.xlu0 %203 }
  0xb1   :  { %v190_v63 = vpop.permute.xlu2 %189 }
  0xb2   :  { %vm193_vm5 = vcmp.eq.s32.totalorder %v518_v39, %v190_v63 }
  0xb5   :  { %v148_v62 = vpop.permute.xlu1 %147 }
  0xb6   :  { %vm151_vm1 = vcmp.eq.s32.totalorder %v518_v39, %v148_v62  ;;  %vm152_vm12 = vcmp.eq.s32.totalorder %v523_v42, %v148_v62 }
  0xb7   :  { %vm155_vm7 = vmor %vm141_vm2, %vm151_vm1  ;;  %vm207_vm2 = vcmp.eq.s32.totalorder %v518_v39, %v204_v1 }
  0xb8   :  { %vm169_vm14 = vmor %vm155_vm7, %vm165_vm13  ;;  %vm670_vm13 = vnez %v665_v61  ;;  %vm164_vm7 = vcmp.eq.s32.totalorder %v523_v42, %v516_v37 }
  0xb9   :  { %vm183_vm11 = vmor %vm169_vm14, %vm179_vm3 }
  0xba   :  { %vm617_vm1 = vmor %vm140_vm8, %vm150_vm9  ;;  %vm166_vm8 = vcmp.eq.s32.totalorder %v523_v42, %v162_v60 }
  0xbb   :  { %vm197_vm15 = vmor %vm183_vm11, %vm193_vm5  ;;  %vm177_vm5 = vcmp.eq.s32.totalorder %v518_v39, %v539_v49 }
  0xbc   :  { %vm142_vm4 = vmor %vm670_vm13, %vm138_vm10  ;;  %vm178_vm10 = vcmp.eq.s32.totalorder %v523_v42, %v539_v49 }
  0xbd   :  { %vm156_vm14 = vmor %vm142_vm4, %vm152_vm12  ;;  %vm180_vm12 = vcmp.eq.s32.totalorder %v523_v42, %v176_v59 }
  0xbe   :  { %v187_v3 = vpop.permute.xlu1 %186  ;;  %vm211_vm3 = vmor %vm197_vm15, %vm207_vm2 }
  0xbf   :  { %vm167_vm9 = vmor %vm611_vm6, %vm163_vm0  ;;  %v318_v5 = vsel %vm211_vm3, 1.0, %v471_v4  ;;  %vm192_vm15 = vcmp.eq.s32.totalorder %v523_v42, %v187_v3  ;;  %vm191_vm6 = vcmp.eq.s32.totalorder %v518_v39, %v187_v3 }
  0xc0   :  { %vm168_vm11 = vmor %vm617_vm1, %vm164_vm7  ;;  %267 = vmatmul.f32.vlgmr.msra.gmra.mxu2 %v318_v5 }
  0xc1   :  { %vm170_vm13 = vmor %vm156_vm14, %vm166_vm8  ;;  %vm241_vm14 = vcmask 261120  }
  0xc2   :  { %vm181_vm4 = vmor %vm167_vm9, %vm177_vm5  ;;  %vm194_vm5 = vcmp.eq.s32.totalorder %v523_v42, %v190_v63 }
  0xc3   :  { %vm182_vm2 = vmor %vm168_vm11, %vm178_vm10 }
  0xc4   :  { %vm184_vm0 = vmor %vm170_vm13, %vm180_vm12  ;;  %vm208_vm12 = vcmp.eq.s32.totalorder %v523_v42, %v204_v1 }
  0xc5   :  { %vm196_vm3 = vmor %vm182_vm2, %vm192_vm15 }
  0xc6   :  { %vm195_vm8 = vmor %vm181_vm4, %vm191_vm6 }
  0xc7   :  { %v201_v6 = vpop.permute.xlu1 %200  ;;  %vm198_vm11 = vmor %vm184_vm0, %vm194_vm5 }
  0xc8   :  { %vm205_vm1 = vcmp.eq.s32.totalorder %v518_v39, %v201_v6  ;;  %vm206_vm7 = vcmp.eq.s32.totalorder %v523_v42, %v201_v6  ;;  %vm212_vm13 = vmor %vm198_vm11, %vm208_vm12 }
  0xc9   :  { %vm210_vm9 = vmor %vm196_vm3, %vm206_vm7  ;;  %v319_v9 = vsel %vm212_vm13, 1.0, %v471_v4 }
  0xca   :  { %vm209_vm10 = vmor %vm195_vm8, %vm205_vm1  ;;  %v317_v7 = vsel %vm210_vm9, 1.0, %v471_v4 }
  0xcb   :  { %v316_v8 = vsel %vm209_vm10, 1.0, %v471_v4  ;;  %320 = vmatmul.msk.f32.vlgmr.msra.gmra.mxu1 %vm241_vm14, %v317_v7 }
  0xcc   :  { %264 = vmatmul.f32.vlgmr.msra.gmra.mxu0 %v316_v8 }
  0xd3   :  { %321 = vmatmul.msk.f32.gmra.mxu1 %vm241_vm14, %v319_v9 }
 0x143   :  { %v268_v13 = vpop.f32.mrf.mxu2 }
 0x148   :  { %v288_v10 = vpop.f32.mrf.mxu1 }
 0x149   :  { %v265_v11 = vpop.f32.mrf.mxu0 }
 0x14a   :  { %v289_v12 = vadd.f32 %v288_v10, %v265_v11 }
 0x14c   :  { %294 = vst [vmem:[#allocation7] sm:$0xff] %v289_v12 }
 0x150   :  { %v291_v14 = vpop.f32.mrf.mxu1 }
 0x151   :  { %v292_v15 = vadd.f32 %v291_v14, %v268_v13 }
 0x153   :  { %295 = vst [vmem:[#allocation7 + $0x8] sm:$0xff] %v292_v15 }
 0x154   :  { %308 = dma.vmem_to_hbm [thread:$0]  %s301_s1, 256, %s303_s23, [#allocation4], %s456_s17, %s456_s17, %s457_s18  }
 0x155   :  { %453 = dma.done.wait [#allocation4], 256  }
 0x156   :  { %454 = vsyncadd [#allocation4], 4294967040 }
 0x157   :  { %313 = vsyncpa [#allocation3], 1 }
 0x158   :  { %314 = vsyncpa [#allocation6], 1 }
 0x159   :  { %315 = vsyncpa [#allocation4], 1 }

</bundles_post_ra>
